<compile_context>
chip_gen: v5e
topology: v5e:2x2
jax: 0.10.0
libtpu: 0.0.40
codegen_flags: <defaults>
</compile_context>

<pallas_src>
import math

import jax
import jax.numpy as jnp
from jax.experimental import pallas as pl
from jax.experimental.pallas import tpu as pltpu


def _svd_head_kernel(se_ref, te_ref, srcc_ref, tgt1_ref, h_ref, acc_ref):
    """One (batch, src-tile) grid step.

    se_ref:   (1, TQ, d_k) bf16 -- src_embedding tile, pre-scaled by 1/sqrt(d_k)
    te_ref:   (1, d_k, N)  bf16 -- full tgt_embedding (resident across src tiles)
    srcc_ref: (1, 3, TQ)   f32  -- src tile, pre-centered by its global mean
    tgt1_ref: (1, 4, N)    f32  -- [tgt ; ones] (resident across src tiles)
    h_ref:    (1, 3, 3)    f32  -- output, written once at the last src tile
    acc_ref:  (3, 3)       f32  -- VMEM accumulator across the src-tile axis
    """
    q = pl.program_id(1)

    @pl.when(q == 0)
    def _():
        acc_ref[...] = jnp.zeros_like(acc_ref)

    se = se_ref[0]      # (TQ, d_k) bf16, already scaled by 1/sqrt(d_k)
    te = te_ref[0]      # (d_k, N)  bf16
    srcc = srcc_ref[0]  # (3, TQ)   f32, globally centered
    tgt1 = tgt1_ref[0]  # (4, N)    f32, rows 0..2 = tgt, row 3 = ones

    # scores = src_emb^T @ tgt_emb / sqrt(d_k): plain MXU dot, no transpose,
    # scale already folded into se in the wrapper.
    scores = jnp.dot(se, te, preferred_element_type=jnp.float32)   # (TQ, N)

    # Numerically stable exp.  The softmax denominator is folded into the
    # next matmul via the ones row of tgt1 — probs (TQ, N) is never built.
    scores = scores - jnp.max(scores, axis=-1, keepdims=True)
    e = jnp.exp(scores)                                             # (TQ, N)

    # unnorm[:3] = tgt @ e^T ; unnorm[3] = sum_j e  (softmax denominator).
    unnorm = jax.lax.dot_general(
        tgt1, e, (((1,), (1,)), ((), ())),
        preferred_element_type=jnp.float32)                         # (4, TQ)
    # Division shrank from N^2 to 3*TQ ops; exact reciprocal is negligible here.
    corr = unnorm[0:3] * pl.reciprocal(unnorm[3:4], approx=False)   # (3, TQ)

    # src was centered with its *global* mean in the wrapper, therefore
    #   H = sum_n src_c[:, n] @ corr[:, n]^T   (no rank-1 correction needed).
    acc_ref[...] += jax.lax.dot_general(
        srcc, corr, (((1,), (1,)), ((), ())),
        preferred_element_type=jnp.float32)                         # (3, 3)

    @pl.when(q == pl.num_programs(1) - 1)
    def _():
        h_ref[0] = acc_ref[...]


def _pick_src_tile(n):
    for tq in (512, 256, 128):
        if n % tq == 0:
            return tq
    return n  # fall back to a single full-width tile (N < 128 or unaligned)


def _cross_covariance(src_embedding, tgt_embedding, src, tgt):
    """Returns (H, src_mean, tgt_mean); H computed by the Pallas kernel."""
    B, d_k, N = src_embedding.shape
    assert tgt_embedding.shape == (B, d_k, N)
    assert src.shape == (B, 3, N) and tgt.shape == (B, 3, N)

    tq = _pick_src_tile(N)
    n_q = N // tq

    src = src.astype(jnp.float32)
    tgt = tgt.astype(jnp.float32)
    src_mean = jnp.mean(src, axis=2, keepdims=True)   # (B, 3, 1)
    tgt_mean = jnp.mean(tgt, axis=2, keepdims=True)   # (B, 3, 1)

    # Cheap O(B*N) prep, fused by XLA:
    #  * transpose + 1/sqrt(d_k) scale + bf16 cast of src_embedding,
    #  * bf16 cast of tgt_embedding,
    #  * global centering of src (removes the cross-tile rank-1 correction),
    #  * ones row appended to tgt (fused softmax denominator).
    inv_sqrt_dk = jnp.float32(1.0 / math.sqrt(d_k))
    se_t = (jnp.swapaxes(src_embedding.astype(jnp.float32), 1, 2)
            * inv_sqrt_dk).astype(jnp.bfloat16)                    # (B, N, d_k)
    te = tgt_embedding.astype(jnp.bfloat16)                        # (B, d_k, N)
    src_centered = src - src_mean                                  # (B, 3, N)
    tgt_aug = jnp.concatenate(
        [tgt, jnp.ones((B, 1, N), jnp.float32)], axis=1)           # (B, 4, N)

    H = pl.pallas_call(
        _svd_head_kernel,
        out_shape=jax.ShapeDtypeStruct((B, 3, 3), jnp.float32),
        grid=(B, n_q),
        in_specs=[
            pl.BlockSpec((1, tq, d_k), lambda b, q: (b, q, 0)),    # se tile
            pl.BlockSpec((1, d_k, N), lambda b, q: (b, 0, 0)),     # te resident
            pl.BlockSpec((1, 3, tq), lambda b, q: (b, q, 0)),      # src tile
            pl.BlockSpec((1, 4, N), lambda b, q: (b, 0, 0)),       # [tgt;1] resident
        ],
        out_specs=pl.BlockSpec((1, 3, 3), lambda b, q: (b, 0, 0)),
        scratch_shapes=[pltpu.VMEM((3, 3), jnp.float32)],
        compiler_params=pltpu.CompilerParams(
            dimension_semantics=("parallel", "arbitrary"),
            vmem_limit_bytes=48 * 1024 * 1024),   # fits v5e/v6e/v7x budgets
    )(se_t, te, src_centered, tgt_aug)

    return H, src_mean, tgt_mean


def svd_head_forward(src_embedding, tgt_embedding, src, tgt):
    """Pallas implementation of SVDHead.forward -> (R (B,3,3), t (B,3))."""
    B = src.shape[0]
    H, src_mean, tgt_mean = _cross_covariance(src_embedding, tgt_embedding, src, tgt)

    # TODO(synk): 3x3 SVD / determinant / reflection fix-up has no Pallas TPU
    # equivalent; done per batch in plain JAX (negligible cost).
    reflect = jnp.diag(jnp.array([1.0, 1.0, -1.0], dtype=jnp.float32))
    u, s, vh = jnp.linalg.svd(H)             # H = u @ diag(s) @ vh
    v = jnp.swapaxes(vh, -1, -2)             # torch.svd's v
    ut = jnp.swapaxes(u, -1, -2)
    r = jnp.matmul(v, ut)
    r_det = jnp.linalg.det(r)
    r_fixed = jnp.matmul(jnp.matmul(v, reflect), ut)
    R = jnp.where((r_det < 0)[:, None, None], r_fixed, r)

    t = jnp.matmul(-R, src_mean) + tgt_mean  # (B, 3, 1)
    return R, t.reshape(B, 3)


def _reference_H(src_embedding, tgt_embedding, src, tgt):
    """Pure-JAX reference for H, mirroring the kernel's bf16 embedding cast."""
    d_k = src_embedding.shape[1]
    hp = jax.lax.Precision.HIGHEST
    se = (src_embedding * jnp.float32(1.0 / math.sqrt(d_k))
          ).astype(jnp.bfloat16).astype(jnp.float32)
    te = tgt_embedding.astype(jnp.bfloat16).astype(jnp.float32)
    scores = jnp.einsum('bdn,bdm->bnm', se, te, precision=hp)
    probs = jax.nn.softmax(scores, axis=2)
    src_corr = jnp.einsum('bcm,bnm->bcn', tgt, probs, precision=hp)
    sc = src - jnp.mean(src, axis=2, keepdims=True)
    cc = src_corr - jnp.mean(src_corr, axis=2, keepdims=True)
    return jnp.einsum('bcn,bdn->bcd', sc, cc, precision=hp)


if __name__ == "__main__":
    def _case(B, d_k, N, key):
        k1, k2, k3, k4 = jax.random.split(key, 4)
        return (jax.random.normal(k1, (B, d_k, N), dtype=jnp.float32),
                jax.random.normal(k2, (B, d_k, N), dtype=jnp.float32),
                jax.random.normal(k3, (B, 3, N), dtype=jnp.float32),
                jax.random.normal(k4, (B, 3, N), dtype=jnp.float32))

    # Small demo shape: B=2, d_k=32, N=16 (single src tile per batch).
    args = _case(2, 32, 16, jax.random.PRNGKey(0))
    R, t = svd_head_forward(*args)
    jax.block_until_ready((R, t))
    assert R.shape == (2, 3, 3) and t.shape == (2, 3)

    # Kernel-side H matches a pure-JAX reference (bf16 cast included on both
    # sides; small tolerance for MXU vs XLA accumulation-order differences).
    H_k, sm, tm = _cross_covariance(*args)
    H_r = _reference_H(*args)
    assert jnp.allclose(H_k, H_r, rtol=1e-2, atol=1e-2), "H mismatch (small case)"
    assert jnp.allclose(sm, jnp.mean(args[2], axis=2, keepdims=True), atol=1e-6)
    assert jnp.allclose(tm, jnp.mean(args[3], axis=2, keepdims=True), atol=1e-6)

    # Rotation sanity: R orthonormal with det +1.
    eye = jnp.broadcast_to(jnp.eye(3, dtype=jnp.float32), R.shape)
    assert jnp.allclose(jnp.matmul(R, jnp.swapaxes(R, -1, -2)), eye, atol=1e-3)
    assert jnp.allclose(jnp.linalg.det(R), 1.0, atol=1e-3)

    # Tiled path: N=256 -> two 128-wide src tiles, exercises the H accumulator.
    args2 = _case(2, 32, 256, jax.random.PRNGKey(1))
    H_k2, _, _ = _cross_covariance(*args2)
    jax.block_until_ready(H_k2)
    H_r2 = _reference_H(*args2)
    assert jnp.allclose(H_k2, H_r2, rtol=1e-2, atol=1e-2), "H mismatch (tiled case)"

    print("KERNEL_OK")
</pallas_src>

<mosaic_0001>
module attributes {stable_mosaic.version = 11 : i64} {
  func.func @_svd_head_kernel(%arg0: i32, %arg1: i32, %arg2: memref<1x16x32xbf16, #tpu.memory_space<vmem>>, %arg3: memref<1x32x16xbf16, #tpu.memory_space<vmem>>, %arg4: memref<1x3x16xf32, #tpu.memory_space<vmem>>, %arg5: memref<1x4x16xf32, #tpu.memory_space<vmem>>, %arg6: memref<1x3x3xf32, #tpu.memory_space<vmem>>, %arg7: memref<3x3xf32, #tpu.memory_space<vmem>>) attributes {dimension_semantics = [#tpu.dimension_semantics<parallel>, #tpu.dimension_semantics<arbitrary>], iteration_bounds = array<i64: 2, 1>, scalar_prefetch = 0 : i64, scratch_operands = 1 : i64, tpu.core_type = #tpu.core_type<tc>, window_params = [{transform_indices = @transform_0, window_bounds = array<i64: 1, 16, 32>}, {transform_indices = @transform_1, window_bounds = array<i64: 1, 32, 16>}, {transform_indices = @transform_2, window_bounds = array<i64: 1, 3, 16>}, {transform_indices = @transform_3, window_bounds = array<i64: 1, 4, 16>}, {transform_indices = @transform_4, window_bounds = array<i64: 1, 3, 3>}]} {
    %c0_i32 = arith.constant 0 : i32
    %0 = arith.cmpi eq, %arg1, %c0_i32 : i32
    %1 = arith.extui %0 : i1 to i32
    %c0_i32_0 = arith.constant 0 : i32
    %2 = arith.cmpi ne, %1, %c0_i32_0 : i32
    scf.if %2 {
      %cst_21 = arith.constant 0.000000e+00 : f32
      %30 = vector.broadcast %cst_21 : f32 to vector<3x3xf32>
      %c0_22 = arith.constant 0 : index
      %c0_23 = arith.constant 0 : index
      %31 = vector.load %arg7[%c0_22, %c0_23] : memref<3x3xf32, #tpu.memory_space<vmem>>, vector<3x3xf32>
      tpu.vector_store %arg7[%c0_22, %c0_23], %30 {strides = array<i32>} : memref<3x3xf32, #tpu.memory_space<vmem>>, vector<3x3xf32>,
    } else {
    }
    %c0 = arith.constant 0 : index
    %c0_1 = arith.constant 0 : index
    %c0_2 = arith.constant 0 : index
    %3 = vector.load %arg2[%c0, %c0_1, %c0_2] : memref<1x16x32xbf16, #tpu.memory_space<vmem>>, vector<1x16x32xbf16>
    %4 = vector.shape_cast %3 : vector<1x16x32xbf16> to vector<16x32xbf16>
    %c0_3 = arith.constant 0 : index
    %c0_4 = arith.constant 0 : index
    %c0_5 = arith.constant 0 : index
    %5 = vector.load %arg3[%c0_3, %c0_4, %c0_5] : memref<1x32x16xbf16, #tpu.memory_space<vmem>>, vector<1x32x16xbf16>
    %6 = vector.shape_cast %5 : vector<1x32x16xbf16> to vector<32x16xbf16>
    %c0_6 = arith.constant 0 : index
    %c0_7 = arith.constant 0 : index
    %c0_8 = arith.constant 0 : index
    %7 = vector.load %arg4[%c0_6, %c0_7, %c0_8] : memref<1x3x16xf32, #tpu.memory_space<vmem>>, vector<1x3x16xf32>
    %8 = vector.shape_cast %7 : vector<1x3x16xf32> to vector<3x16xf32>
    %c0_9 = arith.constant 0 : index
    %c0_10 = arith.constant 0 : index
    %c0_11 = arith.constant 0 : index
    %9 = vector.load %arg5[%c0_9, %c0_10, %c0_11] : memref<1x4x16xf32, #tpu.memory_space<vmem>>, vector<1x4x16xf32>
    %10 = vector.shape_cast %9 : vector<1x4x16xf32> to vector<4x16xf32>
    %cst = arith.constant dense<0.000000e+00> : vector<16x16xf32>
    %11 = tpu.matmul %4, %6, %cst {dimension_numbers = #tpu.dot_dimension_numbers<[1], [0], [0], [1], [0, 0, 1, 1], [], []>} : vector<16x32xbf16>, vector<32x16xbf16>, vector<16x16xf32> -> vector<16x16xf32>
    %cst_12 = arith.constant dense<0xFF800000> : vector<16xf32>
    %12 = vector.multi_reduction <maximumf>, %11, %cst_12 [1] : vector<16x16xf32> to vector<16xf32>
    %13 = vector.shape_cast %12 : vector<16xf32> to vector<16x1xf32>
    %14 = vector.broadcast %13 : vector<16x1xf32> to vector<16x16xf32>
    %15 = arith.subf %11, %14 : vector<16x16xf32>
    %16 = math.exp %15 : vector<16x16xf32>
    %cst_13 = arith.constant dense<0.000000e+00> : vector<4x16xf32>
    %17 = tpu.matmul %10, %16, %cst_13 {dimension_numbers = #tpu.dot_dimension_numbers<[1], [1], [0], [0], [0, 0, 1, 0], [], []>} : vector<4x16xf32>, vector<16x16xf32>, vector<4x16xf32> -> vector<4x16xf32>
    %18 = vector.extract_strided_slice %17 {offsets = [0, 0], sizes = [3, 16], strides = [1, 1]} : vector<4x16xf32> to vector<3x16xf32>
    %19 = vector.extract_strided_slice %17 {offsets = [3, 0], sizes = [1, 16], strides = [1, 1]} : vector<4x16xf32> to vector<1x16xf32>
    %20 = tpu.reciprocal %19 : vector<1x16xf32> -> vector<1x16xf32>
    %21 = vector.broadcast %20 : vector<1x16xf32> to vector<3x16xf32>
    %22 = arith.mulf %18, %21 : vector<3x16xf32>
    %c0_14 = arith.constant 0 : index
    %c0_15 = arith.constant 0 : index
    %23 = vector.load %arg7[%c0_14, %c0_15] : memref<3x3xf32, #tpu.memory_space<vmem>>, vector<3x3xf32>
    %cst_16 = arith.constant dense<0.000000e+00> : vector<3x3xf32>
    %24 = tpu.matmul %8, %22, %cst_16 {dimension_numbers = #tpu.dot_dimension_numbers<[1], [1], [0], [0], [0, 0, 1, 0], [], []>} : vector<3x16xf32>, vector<3x16xf32>, vector<3x3xf32> -> vector<3x3xf32>
    %25 = arith.addf %23, %24 : vector<3x3xf32>
    %c0_17 = arith.constant 0 : index
    %c0_18 = arith.constant 0 : index
    %26 = vector.load %arg7[%c0_17, %c0_18] : memref<3x3xf32, #tpu.memory_space<vmem>>, vector<3x3xf32>
    tpu.vector_store %arg7[%c0_17, %c0_18], %25 {strides = array<i32>} : memref<3x3xf32, #tpu.memory_space<vmem>>, vector<3x3xf32>,
    %c0_i32_19 = arith.constant 0 : i32
    %27 = arith.cmpi eq, %arg1, %c0_i32_19 : i32
    %28 = arith.extui %27 : i1 to i32
    %c0_i32_20 = arith.constant 0 : i32
    %29 = arith.cmpi ne, %28, %c0_i32_20 : i32
    scf.if %29 {
      %c0_21 = arith.constant 0 : index
      %c0_22 = arith.constant 0 : index
      %30 = vector.load %arg7[%c0_21, %c0_22] : memref<3x3xf32, #tpu.memory_space<vmem>>, vector<3x3xf32>
      %c0_23 = arith.constant 0 : index
      %c0_24 = arith.constant 0 : index
      %c0_25 = arith.constant 0 : index
      %31 = vector.load %arg6[%c0_23, %c0_24, %c0_25] : memref<1x3x3xf32, #tpu.memory_space<vmem>>, vector<1x3x3xf32>
      %32 = vector.shape_cast %31 : vector<1x3x3xf32> to vector<3x3xf32>
      %33 = vector.shape_cast %30 : vector<3x3xf32> to vector<1x3x3xf32>
      tpu.vector_store %arg6[%c0_23, %c0_24, %c0_25], %33 {strides = array<i32>} : memref<1x3x3xf32, #tpu.memory_space<vmem>>, vector<1x3x3xf32>,
    } else {
    }
    return
  }
  func.func @transform_0(%arg0: i32, %arg1: i32) -> (i32, i32, i32) {
    %c0_i32 = arith.constant 0 : i32
    %c0_i32_0 = arith.constant 0 : i32
    return %arg0, %arg1, %c0_i32 : i32, i32, i32
  }
  func.func @transform_1(%arg0: i32, %arg1: i32) -> (i32, i32, i32) {
    %c0_i32 = arith.constant 0 : i32
    %c0_i32_0 = arith.constant 0 : i32
    %c0_i32_1 = arith.constant 0 : i32
    return %arg0, %c0_i32, %c0_i32_0 : i32, i32, i32
  }
  func.func @transform_2(%arg0: i32, %arg1: i32) -> (i32, i32, i32) {
    %c0_i32 = arith.constant 0 : i32
    %c0_i32_0 = arith.constant 0 : i32
    return %arg0, %arg1, %c0_i32 : i32, i32, i32
  }
  func.func @transform_3(%arg0: i32, %arg1: i32) -> (i32, i32, i32) {
    %c0_i32 = arith.constant 0 : i32
    %c0_i32_0 = arith.constant 0 : i32
    %c0_i32_1 = arith.constant 0 : i32
    return %arg0, %c0_i32, %c0_i32_0 : i32, i32, i32
  }
  func.func @transform_4(%arg0: i32, %arg1: i32) -> (i32, i32, i32) {
    %c0_i32 = arith.constant 0 : i32
    %c0_i32_0 = arith.constant 0 : i32
    %c0_i32_1 = arith.constant 0 : i32
    return %arg0, %c0_i32, %c0_i32_0 : i32, i32, i32
  }
}

</mosaic_0001>

<bundles_post_ra>
// kernel: tpu_custom_call.1
= control target key start
LH: loop header
LB: loop body
LE: loop exit
PB: predicated region body
PF: predicated region fallthrough
CT: control target
= control target key end

     0   :  { %s656_s15 = smov 0   ;;  %s658_s16 = smov 0   ;;  %s713_s0 = inlined_call_operand.vmem [shape: bf16[2,16,32], index: 0, kind: input, shape index: {}]   ;;  %s714_s1 = inlined_call_operand.vmem [shape: bf16[2,32,16], index: 1, kind: input, shape index: {}]   ;;  %s715_s2 = inlined_call_operand.vmem [shape: f32[2,3,16], index: 2, kind: input, shape index: {}]   ;;  %s716_s3 = inlined_call_operand.vmem [shape: f32[2,4,16], index: 3, kind: input, shape index: {}]   ;;  %s717_s4 = inlined_call_operand.vmem [shape: f32[2,3,3], index: 4, kind: output, shape index: {}]  }
   0x1   :  { %s660_s17 = smov 0  }
   0x2 LB: > { %s26_s18 = sadd.s32 1, %s624_s16  ;;  %p542_p0 = scmp.ge.s32.totalorder %s628_s17, 1  ;;  %s628_s17 = sphi %s660_s17, %s14_s17   ;;  %s624_s16 = sphi %s658_s16, %s719_s16   ;;  %s620_s15 = sphi %s656_s15, %s718_s15  }
   0x3   : > { %p28_p1 = scmp.ge.s32.totalorder %s26_s18, 2  ;;  %p214_p2 = scmp.lt.s32.totalorder %s628_s17, 3 }
   0x5   : > { %s721_s18 = smov (%p28_p1, %s26_s18), 0  ;;  %p215_p3 = pnand %p542_p0, %p214_p2 }
   0x6   : > { %p260_p4 = scmp.lt.s32.totalorder (!%p215_p3), %s620_s15, 1 }
   0x7   : > { %218 = sbr.rel (%p215_p3) target bundleno = 589 (0x24d), region = 36 }
   0xc   : > { %s723_s15 = smov (!%p260_p4, %s620_s15), 1  ;;  %vm321_vm0 = vcmask 261120   ;;  %vm339_vm1 = vcmask 130048   ;;  %vm294_vm2 = vcmask 18432   ;;  %v630_v16 = vmov 0.0  }
   0xd   : > { %s571_s19 = sshll.u32 %s723_s15, 4  ;;  %s570_s23 = sshll.u32 %s723_s15, 3  ;;  %295 = vst.msk [vmem:[#allocation2] sm:$0x7] %vm294_vm2, %v630_v16 }
   0xe   : > { %s273_s22 = scalar_lea.vmem %s714_s1, %s571_s19  ;;  %s267_s26 = scalar_lea.vmem %s713_s0, %s570_s23 }
   0xf   : > { %v574_v0 = vld [vmem:[%s273_s22 + $0x8] sm:$0xff]  ;;  %v573_v1 = vld [vmem:[%s273_s22] sm:$0xff]  ;;  %s683_s27 = sshll.u32 %s723_s15, 2 }
  0x10   : > { %331 = vmatpush.bf16.msra.mxu0 %v574_v0  ;;  %v572_v2 = vld [vmem:[%s267_s26] sm:$0xff]  ;;  %s284_s30 = scalar_lea.vmem %s716_s3, %s683_s27  ;;  %s280_s7 = scalar_lea.vmem %s715_s2, %s683_s27 }
  0x11   : > { %v303_v15 = vld [vmem:[%s284_s30] sm:$0xf]  ;;  %s288_s10 = scalar_lea.vmem %s717_s4, %s683_s27 }
  0x12   : > { %v302_v30 = vld [vmem:[%s280_s7] sm:$0x7] }
  0x14   : > { %332 = vmatpush.bf16.msra.mxu0 %v573_v1  ;;  %v397_v31 = vld [vmem:[#allocation2] sm:$0x7] }
  0x17   : > { %562 = vmatmul.msk.bf16.vlgmr.msra.gmra.mxu0 %vm321_vm0, %v572_v2 }
  0x94   : > { %v334_v3 = vpop.f32.mrf.mxu0 }
  0x95   : > { %v340_v6 = vsel %vm339_vm1, %v334_v3, -inf }
  0x9c   : > { %v336_v4 = vpop.f32.mrf.mxu0 }
  0x9d   : > { %v343_v5 = vsel %vm339_vm1, %v336_v4, -inf }
  0x9e   : > { %344 = vmax.xlane.f32.xlu0 %v343_v5 }
  0xa6   : > { %341 = vmax.xlane.f32.xlu0 %v340_v6 }
 0x111   : > { %v345_v7 = vpop.xlane.xlu0 %344 }
 0x112   : > { %v347_v8 = vsub.f32 %v336_v4, %v345_v7 }
 0x114   : > { %v350_v9 = vmul.f32 1.442695, %v347_v8 }
 0x116   : > { %600 = vpow2.f32 %v350_v9 }
 0x119   : > { %v342_v10 = vpop.xlane.xlu0 %341 }
 0x11a   : > { %v346_v11 = vsub.f32 %v334_v3, %v342_v10 }
 0x11c   : > { %v601_v12 = vpop.eup %600  ;;  %v348_v13 = vmul.f32 1.442695, %v346_v11 }
 0x11d   : > { %563 = vmatpush.xpose.msk.msra.mxu1 %vm339_vm1, %v601_v12 }
 0x11e   : > { %602 = vpow2.f32 %v348_v13 }
 0x124   : > { %v603_v14 = vpop.eup %602 }
 0x125   : > { %564 = vmatpush.xpose.msk.msra.mxu1 %vm339_vm1, %v603_v14 }
 0x128   : > { %565 = vmatmul.msk.f32.vlgmr.msra.gmra.mxu1 %vm339_vm1, %v303_v15 }
 0x1a5   : > { %v378_v17 = vpop.f32.mrf.mxu1 }
 0x1a6   : > { %604 = vrcp.f32 %v378_v17  ;;  %v392_v21 = vand.u32 2147483648, %v378_v17  ;;  %v390_v23 = vand.u32 2147483647, %v378_v17  ;;  %vm386_vm4 = vweird.f32 %v378_v17 }
 0x1a8   : > { %v393_v25 = vor.u32 1.1754944e-38, %v392_v21  ;;  %vm391_vm6 = vcmp.eq.f32.partialorder %v390_v23, 8.507059e+37 }
 0x1ac   : > { %v605_v18 = vpop.eup %604 }
 0x1ad   : > { %v382_v19 = vmul.f32 %v605_v18, %v378_v17  ;;  %vm387_vm3 = vweird.f32 %v605_v18 }
 0x1ae   : > { %vm388_vm5 = vmor %vm386_vm4, %vm387_vm3 }
 0x1af   : > { %v383_v20 = vsub.f32 1.0, %v382_v19 }
 0x1b1   : > { %v384_v22 = vmul.f32 %v605_v18, %v383_v20 }
 0x1b3   : > { %v385_v24 = vadd.f32 %v605_v18, %v384_v22 }
 0x1b5   : > { %v389_v26 = vsel %vm388_vm5, %v605_v18, %v385_v24 }
 0x1b6   : > { %v394_v27 = vsel %vm391_vm6, %v393_v25, %v389_v26 }
 0x1b7   : > { %v395_v28 = vperm.slane %v394_v27, 3 }
 0x1b9   : > { %v396_v29 = vmul.f32 %v395_v28, %v378_v17 }
 0x1bb   : > { %566 = vmatpush.xpose.msk.msra.mxu2 %vm339_vm1, %v396_v29 }
 0x1be   : > { %567 = vmatmul.msk.f32.vlgmr.msra.gmra.mxu2 %vm339_vm1, %v302_v30 }
 0x241   : > { %v421_v32 = vpop.f32.mrf.mxu2 }
 0x242   : > { %v424_v33 = vadd.f32 %v421_v32, %v397_v31 }
 0x244   : > { %426 = vst.msk [vmem:[#allocation2] sm:$0x7] %vm294_vm2, %v424_v33 }
 0x24b   : > { %v430_v34 = vld [vmem:[#allocation2] sm:$0x7] }
 0x24c   : > { %431 = vst.msk [vmem:[%s288_s10] sm:$0x7] %vm294_vm2, %v430_v34 }
 0x24d PF: > { %s14_s17 = sadd.s32 1, %s628_s17   ;;  %s718_s15 = smov %s624_s16 }
 0x24e   : > { %p11_p5 = scmp.ge.s32.totalorder %s14_s17, 4   ;;  %s719_s16 = smov %s721_s18 }
 0x250   :  { %13 = sbr.rel (!%p11_p5) target bundleno = 2 (0x2), region = 83 }

</bundles_post_ra>
